<compile_context>
chip_gen: v7x
topology: tpu7x:2x2x1
jax: 0.10.0
libtpu: 0.0.40
codegen_flags: <defaults>
</compile_context>

<pallas_src>
import functools
import math

import jax
import jax.numpy as jnp
from jax.experimental import pallas as pl
from jax.experimental.pallas import tpu as pltpu


def _round_up(x, m):
    return ((x + m - 1) // m) * m


# ----------------------------------------------------------------------------
# Per-generation VMEM budget (v5e/v6e: 128 MiB physical -> 96 MiB; v7x: 64 -> 48)
# ----------------------------------------------------------------------------

_VMEM_LIMIT_CACHE = None


def _vmem_limit():
    global _VMEM_LIMIT_CACHE
    if _VMEM_LIMIT_CACHE is None:
        try:
            cap = int(pltpu.get_tpu_info().vmem_capacity_bytes)
            _VMEM_LIMIT_CACHE = min(cap * 3 // 4, 96 * 1024 * 1024)
        except Exception:
            _VMEM_LIMIT_CACHE = 48 * 1024 * 1024
    return _VMEM_LIMIT_CACHE


# ----------------------------------------------------------------------------
# Tile selection helpers
# ----------------------------------------------------------------------------

def _pick_n_tile(N, tn_max=512):
    """Return (tn, Np): lane tile and padded N. Padding decided once at weight prep."""
    if N <= tn_max:
        return N, N                       # full-dim block is always legal
    t = (tn_max // 128) * 128
    while t >= 128:
        if N % t == 0:
            return t, N
        t -= 128
    Np = _round_up(N, 128)
    t = (tn_max // 128) * 128
    while t >= 128:
        if Np % t == 0:
            return t, Np
        t -= 128
    return 128, Np


def _pick_k_tile(K, tk_max=1024):
    if K <= tk_max:
        return K
    t = (tk_max // 128) * 128
    while t >= 128:
        if K % t == 0:
            return t
        t -= 128
    return K                              # fall back to a single full-K step


def _prep_linear(w, b=None, tn_max=512):
    """Prepare a linear layer once: bf16 weight, padded N, fp32 (1, Np) bias."""
    w = jnp.asarray(w)
    K, N = w.shape
    tn, Np = _pick_n_tile(N, tn_max)
    wp = w.astype(jnp.bfloat16)
    if Np != N:
        wp = jnp.pad(wp, ((0, 0), (0, Np - N)))
    if b is None:
        bp = jnp.zeros((1, Np), jnp.float32)
    else:
        bp = jnp.pad(jnp.asarray(b, jnp.float32), (0, Np - N)).reshape(1, Np)
    return dict(w=wp, b=bp, n=N, tn=tn)


# ----------------------------------------------------------------------------
# Tiled matmul kernel (K-axis accumulation), optional QuickGELU + residual add
# ----------------------------------------------------------------------------

def _matmul_kernel(*refs, activation, has_residual):
    x_ref, w_ref, b_ref = refs[0], refs[1], refs[2]
    idx = 3
    res_ref = None
    if has_residual:
        res_ref = refs[idx]
        idx += 1
    o_ref = refs[idx]
    acc_ref = refs[idx + 1]

    @pl.when(pl.program_id(2) == 0)
    def _():
        acc_ref[...] = jnp.zeros_like(acc_ref)

    acc_ref[...] += jnp.dot(x_ref[...], w_ref[...],
                            preferred_element_type=jnp.float32)

    @pl.when(pl.program_id(2) == pl.num_programs(2) - 1)
    def _():
        acc = acc_ref[...] + b_ref[...]
        if activation == "quick_gelu":
            acc = acc * jax.nn.sigmoid(1.702 * acc)
        if has_residual:
            acc = acc + res_ref[...]
        o_ref[...] = acc.astype(o_ref.dtype)


def matmul(x, lin, *, activation=None, residual=None, out_dtype=jnp.float32,
           tm_max=256, tk_max=1024):
    """x:(M,K) @ prepped weight + bias; bf16 MXU inputs, fp32 accumulation."""
    M, K = x.shape
    wp, bp, N, tn = lin["w"], lin["b"], lin["n"], lin["tn"]
    Np = wp.shape[1]
    tm = min(tm_max, _round_up(M, 8))
    Mp = _round_up(M, tm)
    tk = _pick_k_tile(K, tk_max)

    xp = x.astype(jnp.bfloat16)
    if Mp != M:
        xp = jnp.pad(xp, ((0, Mp - M), (0, 0)))

    in_specs = [
        pl.BlockSpec((tm, tk), lambda i, j, k: (i, k)),
        pl.BlockSpec((tk, tn), lambda i, j, k: (k, j)),
        pl.BlockSpec((1, tn), lambda i, j, k: (0, j)),
    ]
    args = [xp, wp, bp]
    if residual is not None:
        rp = residual.astype(jnp.float32)
        if Mp != M or Np != N:
            rp = jnp.pad(rp, ((0, Mp - M), (0, Np - N)))
        in_specs.append(pl.BlockSpec((tm, tn), lambda i, j, k: (i, j)))
        args.append(rp)

    out = pl.pallas_call(
        functools.partial(_matmul_kernel, activation=activation,
                          has_residual=residual is not None),
        grid=(Mp // tm, Np // tn, K // tk),
        in_specs=in_specs,
        out_specs=pl.BlockSpec((tm, tn), lambda i, j, k: (i, j)),
        out_shape=jax.ShapeDtypeStruct((Mp, Np), out_dtype),
        scratch_shapes=[pltpu.VMEM((tm, tn), jnp.float32)],
        compiler_params=pltpu.CompilerParams(
            dimension_semantics=("parallel", "parallel", "arbitrary"),
            vmem_limit_bytes=_vmem_limit()),
    )(*args)

    if Mp != M:
        out = out[:M]
    if Np != N:
        out = out[:, :N]
    return out


# ----------------------------------------------------------------------------
# Fused LayerNorm + matmul kernel: LN computed ONCE per row tile (j == 0) into a
# VMEM scratch and reused across all N tiles; optional QuickGELU
# ----------------------------------------------------------------------------

def _ln_matmul_kernel(x_ref, g_ref, be_ref, w_ref, b_ref, o_ref, xn_ref, *, activation):
    @pl.when(pl.program_id(1) == 0)
    def _():
        x = x_ref[...].astype(jnp.float32)
        mean = jnp.mean(x, axis=-1, keepdims=True)
        var = jnp.mean(jnp.square(x - mean), axis=-1, keepdims=True)
        xn = (x - mean) * jax.lax.rsqrt(var + 1e-5)
        xn_ref[...] = (xn * g_ref[...] + be_ref[...]).astype(xn_ref.dtype)

    acc = jnp.dot(xn_ref[...], w_ref[...], preferred_element_type=jnp.float32)
    acc = acc + b_ref[...]
    if activation == "quick_gelu":
        acc = acc * jax.nn.sigmoid(1.702 * acc)
    o_ref[...] = acc.astype(o_ref.dtype)


def ln_matmul(x, gamma, beta, lin, *, activation=None, out_dtype=jnp.float32,
              tm_max=256):
    """LayerNorm(x) @ prepped weight + bias; LN fp32, matmul bf16 MXU, no HBM LN output."""
    M, K = x.shape
    wp, bp, N, tn = lin["w"], lin["b"], lin["n"], lin["tn"]
    Np = wp.shape[1]
    tm = min(tm_max, _round_up(M, 8))
    Mp = _round_up(M, tm)

    xp = x.astype(jnp.float32)
    if Mp != M:
        xp = jnp.pad(xp, ((0, Mp - M), (0, 0)))
    g2 = gamma.reshape(1, K).astype(jnp.float32)
    be2 = beta.reshape(1, K).astype(jnp.float32)

    out = pl.pallas_call(
        functools.partial(_ln_matmul_kernel, activation=activation),
        grid=(Mp // tm, Np // tn),
        in_specs=[
            pl.BlockSpec((tm, K), lambda i, j: (i, 0)),
            pl.BlockSpec((1, K), lambda i, j: (0, 0)),
            pl.BlockSpec((1, K), lambda i, j: (0, 0)),
            pl.BlockSpec((K, tn), lambda i, j: (0, j)),
            pl.BlockSpec((1, tn), lambda i, j: (0, j)),
        ],
        out_specs=pl.BlockSpec((tm, tn), lambda i, j: (i, j)),
        out_shape=jax.ShapeDtypeStruct((Mp, Np), out_dtype),
        scratch_shapes=[pltpu.VMEM((tm, K), jnp.bfloat16)],
        compiler_params=pltpu.CompilerParams(
            dimension_semantics=("parallel", "arbitrary"),
            vmem_limit_bytes=_vmem_limit()),
    )(xp, g2, be2, wp, bp)

    if Mp != M:
        out = out[:M]
    if Np != N:
        out = out[:, :N]
    return out


# ----------------------------------------------------------------------------
# Standalone row-tiled LayerNorm (only for ln_pre, whose output is the residual stream)
# ----------------------------------------------------------------------------

def _ln_kernel(x_ref, g_ref, b_ref, o_ref):
    x = x_ref[...].astype(jnp.float32)
    mean = jnp.mean(x, axis=-1, keepdims=True)
    var = jnp.mean(jnp.square(x - mean), axis=-1, keepdims=True)
    y = (x - mean) * jax.lax.rsqrt(var + 1e-5)
    o_ref[...] = (y * g_ref[...] + b_ref[...]).astype(o_ref.dtype)


def layernorm(x, g, b, tm_max=512):
    M, D = x.shape
    tm = min(tm_max, _round_up(M, 8))
    Mp = _round_up(M, tm)
    xp = x.astype(jnp.float32)
    if Mp != M:
        xp = jnp.pad(xp, ((0, Mp - M), (0, 0)))
    out = pl.pallas_call(
        _ln_kernel,
        grid=(Mp // tm,),
        in_specs=[
            pl.BlockSpec((tm, D), lambda i: (i, 0)),
            pl.BlockSpec((1, D), lambda i: (0, 0)),
            pl.BlockSpec((1, D), lambda i: (0, 0)),
        ],
        out_specs=pl.BlockSpec((tm, D), lambda i: (i, 0)),
        out_shape=jax.ShapeDtypeStruct((Mp, D), jnp.float32),
        compiler_params=pltpu.CompilerParams(
            dimension_semantics=("parallel",),
            vmem_limit_bytes=_vmem_limit()),
    )(xp, g.reshape(1, D).astype(jnp.float32), b.reshape(1, D).astype(jnp.float32))
    return out if Mp == M else out[:M]


# ----------------------------------------------------------------------------
# Multi-head attention: one batch element per grid step; packed (L, 3D) qkv input,
# per-head (L, L) score blocks, lane-dense (L, D) output.
# TODO(synk): for production sequence lengths (L >= 577 on v7x) tile the KV axis with
# an online-softmax accumulator instead of materializing per-head (L, L) scores.
# ----------------------------------------------------------------------------

def _attn_kernel(*refs, scale, n_head, has_mask, has_kpm, need_weights):
    idx = 0
    mask_ref = kpm_ref = None
    if has_mask:
        mask_ref = refs[idx]
        idx += 1
    if has_kpm:
        kpm_ref = refs[idx]
        idx += 1
    qkv_ref = refs[idx]
    idx += 1
    o_ref = refs[idx]
    idx += 1
    p_ref = refs[idx] if need_weights else None

    qkv = qkv_ref[...]                              # (L, 3D) bf16
    L, threeD = qkv.shape
    D = threeD // 3
    hd = D // n_head

    bias = None
    if has_mask:
        bias = mask_ref[...]                        # (L, L) additive causal mask
    if has_kpm:
        kb = kpm_ref[...]                           # (1, L) key-padding bias
        bias = kb if bias is None else bias + kb

    outs = []
    p_sum = None
    for h in range(n_head):                         # static unroll over heads
        qh = qkv[:, h * hd:(h + 1) * hd]
        kh = qkv[:, D + h * hd:D + (h + 1) * hd]
        vh = qkv[:, 2 * D + h * hd:2 * D + (h + 1) * hd]
        s = jax.lax.dot_general(qh, kh, (((1,), (1,)), ((), ())),
                                preferred_element_type=jnp.float32) * scale
        if bias is not None:
            s = s + bias
        m = jnp.max(s, axis=-1, keepdims=True)
        e = jnp.exp(s - m)
        denom = jnp.sum(e, axis=-1, keepdims=True)
        if need_weights:
            p = e / denom                           # exact: probs are a model output
        else:
            p = e * pl.reciprocal(denom, approx=True)
        outs.append(jnp.dot(p.astype(vh.dtype), vh,
                            preferred_element_type=jnp.float32))
        if need_weights:
            p_sum = p if p_sum is None else p_sum + p

    o_ref[...] = jnp.concatenate(outs, axis=-1).astype(o_ref.dtype)
    if need_weights:
        p_ref[...] = p_sum * (1.0 / n_head)


def attention(qkv, n_head, attn_mask=None, kpm_bias=None, need_weights=False):
    """qkv: (B, L, 3D) bf16. Returns (out (B, L, D) bf16, head-avg probs (B,L,L)|None)."""
    B, L, threeD = qkv.shape
    D = threeD // 3
    hd = D // n_head
    scale = 1.0 / math.sqrt(hd)

    in_specs = []
    args = []
    if attn_mask is not None:
        in_specs.append(pl.BlockSpec((L, L), lambda b: (0, 0)))
        args.append(attn_mask)
    if kpm_bias is not None:
        in_specs.append(pl.BlockSpec((pl.Squeezed(), 1, L), lambda b: (b, 0, 0)))
        args.append(kpm_bias.reshape(B, 1, L))
    in_specs.append(pl.BlockSpec((pl.Squeezed(), L, threeD), lambda b: (b, 0, 0)))
    args.append(qkv)

    o_spec = pl.BlockSpec((pl.Squeezed(), L, D), lambda b: (b, 0, 0))
    o_sds = jax.ShapeDtypeStruct((B, L, D), jnp.bfloat16)
    if need_weights:
        out_specs = (o_spec, pl.BlockSpec((pl.Squeezed(), L, L), lambda b: (b, 0, 0)))
        out_shape = (o_sds, jax.ShapeDtypeStruct((B, L, L), jnp.float32))
    else:
        out_specs = o_spec
        out_shape = o_sds

    kernel = functools.partial(
        _attn_kernel, scale=scale, n_head=n_head,
        has_mask=attn_mask is not None,
        has_kpm=kpm_bias is not None,
        need_weights=need_weights)

    result = pl.pallas_call(
        kernel,
        grid=(B,),
        in_specs=in_specs,
        out_specs=out_specs,
        out_shape=out_shape,
        compiler_params=pltpu.CompilerParams(
            dimension_semantics=("parallel",),
            vmem_limit_bytes=_vmem_limit()),
    )(*args)

    if need_weights:
        o, probs = result
        return o, probs
    return result, None


# ----------------------------------------------------------------------------
# Final normalized logit matmul
# ----------------------------------------------------------------------------

def _clip_logits_kernel(img_ref, txt_ref, scale_ref, o_ref):
    img = img_ref[...]
    txt = txt_ref[...]
    img = img * jax.lax.rsqrt(jnp.sum(img * img, axis=-1, keepdims=True))
    txt = txt * jax.lax.rsqrt(jnp.sum(txt * txt, axis=-1, keepdims=True))
    logits = jax.lax.dot_general(img, txt, (((1,), (1,)), ((), ())),
                                 preferred_element_type=jnp.float32)
    o_ref[...] = logits * scale_ref[...]


def clip_logits(img_feat, txt_feat, logit_scale):
    Bi, E = img_feat.shape
    Bt = txt_feat.shape[0]
    return pl.pallas_call(
        _clip_logits_kernel,
        grid=(1,),
        in_specs=[
            pl.BlockSpec((Bi, E), lambda i: (0, 0)),
            pl.BlockSpec((Bt, E), lambda i: (0, 0)),
            pl.BlockSpec((1, 1), lambda i: (0, 0)),
        ],
        out_specs=pl.BlockSpec((Bi, Bt), lambda i: (0, 0)),
        out_shape=jax.ShapeDtypeStruct((Bi, Bt), jnp.float32),
    )(img_feat.astype(jnp.float32), txt_feat.astype(jnp.float32),
      logit_scale.reshape(1, 1).astype(jnp.float32))


# ----------------------------------------------------------------------------
# ResidualAttentionBlock, built from the fused kernels above
# ----------------------------------------------------------------------------

def resblock(x2d, B, L, p, n_head, attn_mask=None, kpm_bias=None, need_weights=False):
    """x2d: (Mp, D) fp32 residual stream (row-padded once per tower)."""
    M = B * L
    D = p["d_model"]
    Mp = x2d.shape[0]

    # fused LN1 + QKV projection; qkv stored bf16, packed (B, L, 3D) — no head transposes
    qkv = ln_matmul(x2d, p["ln1_g"], p["ln1_b"], p["in_proj"], out_dtype=jnp.bfloat16)
    qkv = qkv[:M].reshape(B, L, 3 * D)

    o, probs = attention(qkv, n_head, attn_mask=attn_mask, kpm_bias=kpm_bias,
                         need_weights=need_weights)           # (B, L, D) bf16
    o2d = o.reshape(M, D)
    if Mp != M:
        o2d = jnp.pad(o2d, ((0, Mp - M), (0, 0)))

    # out-projection with fused residual add
    x2d = matmul(o2d, p["out_proj"], residual=x2d)            # (Mp, D) fp32

    # fused LN2 + c_fc + QuickGELU; hidden stored bf16
    h = ln_matmul(x2d, p["ln2_g"], p["ln2_b"], p["c_fc"],
                  activation="quick_gelu", out_dtype=jnp.bfloat16)
    # c_proj with fused residual add
    x2d = matmul(h, p["c_proj"], residual=x2d)                # (Mp, D) fp32
    return x2d, probs


# ----------------------------------------------------------------------------
# Vision and text encoders
# ----------------------------------------------------------------------------

def encode_image(params, image):
    B, C, Hh, Ww = image.shape
    ps = params["patch_size"]
    nH, nW = Hh // ps, Ww // ps
    nP = nH * nW
    width = params["vision_width"]

    # conv1 (stride=patch, no bias) rewritten as a patch-matrix matmul
    patches = image.reshape(B, C, nH, ps, nW, ps).transpose(0, 2, 4, 1, 3, 5)
    patches = patches.reshape(B * nP, C * ps * ps)
    x = matmul(patches, params["conv1"]).reshape(B, nP, width)

    cls = jnp.broadcast_to(params["cls_emb"][None, None, :], (B, 1, width))
    x = jnp.concatenate([cls, x], axis=1) + params["vis_pos"][None, :, :]
    L = nP + 1
    M = B * L
    x2d = x.reshape(M, width).astype(jnp.float32)

    # pad the residual stream once to a row-tile-aligned Mp for the whole tower
    tm = min(256, _round_up(M, 8))
    Mp = _round_up(M, tm)
    if Mp != M:
        x2d = jnp.pad(x2d, ((0, Mp - M), (0, 0)))

    x2d = layernorm(x2d, params["ln_pre_g"], params["ln_pre_b"])

    n_blocks = len(params["vis_blocks"])
    attn_weight = None
    for bi, blk in enumerate(params["vis_blocks"]):
        # only the last block's attention weights are returned by the module
        x2d, aw = resblock(x2d, B, L, blk, n_head=params["vision_heads"],
                           need_weights=(bi == n_blocks - 1))
        if aw is not None:
            attn_weight = aw

    # fused ln_post + projection
    xproj = ln_matmul(x2d, params["ln_post_g"], params["ln_post_b"], params["vis_proj"])
    E = params["vis_proj"]["n"]
    xproj = xproj[:M].reshape(B, L, E)

    cls_token = xproj[:, 0]                                   # (B, E)
    seq_tokens = jnp.transpose(xproj[:, 1:], (1, 0, 2))       # (L-1, B, E)
    attn_weight = attn_weight[:, 0, 1:]                       # (B, nP)
    return seq_tokens, attn_weight, cls_token


def encode_text(params, text, key_padding_mask):
    B, T = text.shape
    width = params["transformer_width"]

    x = jnp.take(params["txt_tok_emb"], text, axis=0)         # (B, T, width)
    x = x + params["txt_pos"][:T][None, :, :]
    M = B * T
    x2d = x.reshape(M, width).astype(jnp.float32)

    tm = min(256, _round_up(M, 8))
    Mp = _round_up(M, tm)
    if Mp != M:
        x2d = jnp.pad(x2d, ((0, Mp - M), (0, 0)))

    # compact masks: (T,T) causal additive mask + (B,T) key-padding bias,
    # combined inside the attention kernel (never materialized at (B*H,T,T)).
    row = jnp.arange(T)
    attn_mask = jnp.where(row[None, :] > row[:, None], -1e30, 0.0).astype(jnp.float32)
    kpm_bias = jnp.where(key_padding_mask, -1e30, 0.0).astype(jnp.float32)

    n_blocks = len(params["txt_blocks"])
    attn_weight = None
    for bi, blk in enumerate(params["txt_blocks"]):
        x2d, aw = resblock(x2d, B, T, blk,
                           n_head=params["transformer_heads"],
                           attn_mask=attn_mask, kpm_bias=kpm_bias,
                           need_weights=(bi == n_blocks - 1))
        if aw is not None:
            attn_weight = aw

    EOS = jnp.argmax(text, axis=-1)                           # (B,)
    aw = attn_weight[jnp.arange(B), EOS]                      # (B, T)
    aw = aw.at[jnp.arange(B), EOS].set(0.0)
    new_key_padding_mask = key_padding_mask | (text == 49407)

    # fused ln_final + text projection
    xp = ln_matmul(x2d, params["ln_final_g"], params["ln_final_b"],
                   params["text_projection"])
    E = params["text_projection"]["n"]
    xp = xp[:M].reshape(B, T, E)

    EOS_token = xp[jnp.arange(B), EOS]                        # (B, E)
    seq_tokens = jnp.transpose(xp, (1, 0, 2))                 # (T, B, E)
    return seq_tokens, aw, new_key_padding_mask, EOS_token


def clip_forward(params, image, text, key_padding_mask):
    img_seq, img_attn, cls_token = encode_image(params, image)
    txt_seq, txt_attn, new_kpm, eos_token = encode_text(params, text, key_padding_mask)
    # TODO(synk): the source CLIP.forward calls .norm() on the tuples returned by
    # encode_image/encode_text, which is ill-defined; here we use the standard CLIP
    # features (cls_token for image, EOS_token for text) for the logit matmul.
    logit_scale = jnp.exp(params["logit_scale"])
    logits_per_image = clip_logits(cls_token, eos_token, logit_scale)
    logits_per_text = logits_per_image.T
    return logits_per_image, logits_per_text


# ----------------------------------------------------------------------------
# Deterministic synthetic parameter initialization (weights prepped bf16 once here)
# ----------------------------------------------------------------------------

def _init_block(key, width):
    attn_std = width ** (-0.5)
    proj_std = attn_std * (2 * 2) ** (-0.5)
    fc_std = (2 * width) ** (-0.5)
    ks = jax.random.split(key, 4)
    in_w = attn_std * jax.random.normal(ks[0], (width, 3 * width), jnp.float32)
    out_w = proj_std * jax.random.normal(ks[1], (width, width), jnp.float32)
    fc_w = fc_std * jax.random.normal(ks[2], (width, 4 * width), jnp.float32)
    proj_w = proj_std * jax.random.normal(ks[3], (4 * width, width), jnp.float32)
    return dict(
        d_model=width,
        in_proj=_prep_linear(in_w, jnp.zeros((3 * width,), jnp.float32)),
        out_proj=_prep_linear(out_w, jnp.zeros((width,), jnp.float32)),
        c_fc=_prep_linear(fc_w, jnp.zeros((4 * width,), jnp.float32)),
        c_proj=_prep_linear(proj_w, jnp.zeros((width,), jnp.float32)),
        ln1_g=jnp.ones((width,), jnp.float32),
        ln1_b=jnp.zeros((width,), jnp.float32),
        ln2_g=jnp.ones((width,), jnp.float32),
        ln2_b=jnp.zeros((width,), jnp.float32),
    )


def init_clip_params(key, cfg):
    vw = cfg["vision_width"]
    tw = cfg["transformer_width"]
    ps = cfg["vision_patch_size"]
    nP = (cfg["image_resolution"] // ps) ** 2
    scale = vw ** (-0.5)

    keys = jax.random.split(key, 16)
    conv_w = 0.02 * jax.random.normal(keys[0], (vw, 3, ps, ps), jnp.float32)

    params = dict(
        patch_size=ps,
        vision_width=vw,
        vision_heads=vw // 64,
        transformer_width=tw,
        transformer_heads=cfg["transformer_heads"],
        # vision tower
        conv1=_prep_linear(conv_w.reshape(vw, 3 * ps * ps).T),       # (3*p*p, width)
        cls_emb=scale * jax.random.normal(keys[1], (vw,), jnp.float32),
        vis_pos=scale * jax.random.normal(keys[2], (nP + 1, vw), jnp.float32),
        ln_pre_g=jnp.ones((vw,), jnp.float32),
        ln_pre_b=jnp.zeros((vw,), jnp.float32),
        ln_post_g=jnp.ones((vw,), jnp.float32),
        ln_post_b=jnp.zeros((vw,), jnp.float32),
        vis_proj=_prep_linear(
            scale * jax.random.normal(keys[3], (vw, cfg["embed_dim"]), jnp.float32)),
        vis_blocks=[_init_block(k, vw) for k in
                    jax.random.split(keys[4], cfg["vision_layers"])],
        # text tower
        txt_tok_emb=0.02 * jax.random.normal(keys[5], (cfg["vocab_size"], tw), jnp.float32),
        txt_pos=0.01 * jax.random.normal(keys[6], (cfg["context_length"], tw), jnp.float32),
        ln_final_g=jnp.ones((tw,), jnp.float32),
        ln_final_b=jnp.zeros((tw,), jnp.float32),
        text_projection=_prep_linear(
            (tw ** -0.5) * jax.random.normal(keys[7], (tw, cfg["embed_dim"]), jnp.float32)),
        txt_blocks=[_init_block(k, tw) for k in
                    jax.random.split(keys[8], cfg["transformer_layers"])],
        logit_scale=jnp.asarray(math.log(1.0 / 0.07), jnp.float32),
    )
    return params


# ----------------------------------------------------------------------------
# Main
# ----------------------------------------------------------------------------

if __name__ == "__main__":
    cfg = dict(
        embed_dim=16,
        image_resolution=16,
        vision_layers=2,
        vision_width=64,          # vision_heads = 64 // 64 = 1
        vision_patch_size=8,      # 2x2 = 4 patches + 1 cls token
        context_length=8,
        vocab_size=512,
        transformer_width=32,
        transformer_heads=4,
        transformer_layers=2,
    )

    key = jax.random.PRNGKey(0)
    pkey, ikey, tkey = jax.random.split(key, 3)
    params = init_clip_params(pkey, cfg)

    B = 2
    image = jax.random.normal(ikey, (B, 3, cfg["image_resolution"],
                                     cfg["image_resolution"]), jnp.float32)
    text = jax.random.randint(tkey, (B, cfg["context_length"]), 1, cfg["vocab_size"],
                              dtype=jnp.int32)
    lengths = jnp.array([cfg["context_length"], cfg["context_length"] - 2])
    key_padding_mask = jnp.arange(cfg["context_length"])[None, :] >= lengths[:, None]

    logits_per_image, logits_per_text = clip_forward(params, image, text, key_padding_mask)
    jax.block_until_ready((logits_per_image, logits_per_text))
    print("KERNEL_OK")
</pallas_src>

<mosaic_0001>
module attributes {stable_mosaic.version = 11 : i64} {
  func.func @_matmul_kernel(%arg0: i32, %arg1: i32, %arg2: i32, %arg3: memref<8x192xbf16, #tpu.memory_space<vmem>>, %arg4: memref<192x64xbf16, #tpu.memory_space<vmem>>, %arg5: memref<1x64xf32, #tpu.memory_space<vmem>>, %arg6: memref<8x64xf32, #tpu.memory_space<vmem>>, %arg7: memref<8x64xf32, #tpu.memory_space<vmem>>) attributes {dimension_semantics = [#tpu.dimension_semantics<parallel>, #tpu.dimension_semantics<parallel>, #tpu.dimension_semantics<arbitrary>], iteration_bounds = array<i64: 1, 1, 1>, scalar_prefetch = 0 : i64, scratch_operands = 1 : i64, tpu.core_type = #tpu.core_type<tc>, window_params = [{transform_indices = @transform_0, window_bounds = array<i64: 8, 192>}, {transform_indices = @transform_1, window_bounds = array<i64: 192, 64>}, {transform_indices = @transform_2, window_bounds = array<i64: 1, 64>}, {transform_indices = @transform_3, window_bounds = array<i64: 8, 64>}]} {
    %c0_i32 = arith.constant 0 : i32
    %0 = arith.cmpi eq, %arg2, %c0_i32 : i32
    %1 = arith.extui %0 : i1 to i32
    %c0_i32_0 = arith.constant 0 : i32
    %2 = arith.cmpi ne, %1, %c0_i32_0 : i32
    scf.if %2 {
      %cst_10 = arith.constant 0.000000e+00 : f32
      %12 = vector.broadcast %cst_10 : f32 to vector<8x64xf32>
      %c0_11 = arith.constant 0 : index
      %c0_12 = arith.constant 0 : index
      %13 = vector.load %arg7[%c0_11, %c0_12] : memref<8x64xf32, #tpu.memory_space<vmem>>, vector<8x64xf32>
      tpu.vector_store %arg7[%c0_11, %c0_12], %12 {strides = array<i32>} : memref<8x64xf32, #tpu.memory_space<vmem>>, vector<8x64xf32>,
    } else {
    }
    %c0 = arith.constant 0 : index
    %c0_1 = arith.constant 0 : index
    %3 = vector.load %arg7[%c0, %c0_1] : memref<8x64xf32, #tpu.memory_space<vmem>>, vector<8x64xf32>
    %c0_2 = arith.constant 0 : index
    %c0_3 = arith.constant 0 : index
    %4 = vector.load %arg3[%c0_2, %c0_3] : memref<8x192xbf16, #tpu.memory_space<vmem>>, vector<8x192xbf16>
    %c0_4 = arith.constant 0 : index
    %c0_5 = arith.constant 0 : index
    %5 = vector.load %arg4[%c0_4, %c0_5] : memref<192x64xbf16, #tpu.memory_space<vmem>>, vector<192x64xbf16>
    %cst = arith.constant dense<0.000000e+00> : vector<8x64xf32>
    %6 = tpu.matmul %4, %5, %cst {dimension_numbers = #tpu.dot_dimension_numbers<[1], [0], [0], [1], [0, 0, 1, 1], [], []>} : vector<8x192xbf16>, vector<192x64xbf16>, vector<8x64xf32> -> vector<8x64xf32>
    %7 = arith.addf %3, %6 : vector<8x64xf32>
    %c0_6 = arith.constant 0 : index
    %c0_7 = arith.constant 0 : index
    %8 = vector.load %arg7[%c0_6, %c0_7] : memref<8x64xf32, #tpu.memory_space<vmem>>, vector<8x64xf32>
    tpu.vector_store %arg7[%c0_6, %c0_7], %7 {strides = array<i32>} : memref<8x64xf32, #tpu.memory_space<vmem>>, vector<8x64xf32>,
    %c0_i32_8 = arith.constant 0 : i32
    %9 = arith.cmpi eq, %arg2, %c0_i32_8 : i32
    %10 = arith.extui %9 : i1 to i32
    %c0_i32_9 = arith.constant 0 : i32
    %11 = arith.cmpi ne, %10, %c0_i32_9 : i32
    scf.if %11 {
      %c0_10 = arith.constant 0 : index
      %c0_11 = arith.constant 0 : index
      %12 = vector.load %arg7[%c0_10, %c0_11] : memref<8x64xf32, #tpu.memory_space<vmem>>, vector<8x64xf32>
      %c0_12 = arith.constant 0 : index
      %c0_13 = arith.constant 0 : index
      %13 = vector.load %arg5[%c0_12, %c0_13] : memref<1x64xf32, #tpu.memory_space<vmem>>, vector<1x64xf32>
      %14 = vector.broadcast %13 : vector<1x64xf32> to vector<8x64xf32>
      %15 = arith.addf %12, %14 : vector<8x64xf32>
      %c0_14 = arith.constant 0 : index
      %c0_15 = arith.constant 0 : index
      %16 = vector.load %arg6[%c0_14, %c0_15] : memref<8x64xf32, #tpu.memory_space<vmem>>, vector<8x64xf32>
      tpu.vector_store %arg6[%c0_14, %c0_15], %15 {strides = array<i32>} : memref<8x64xf32, #tpu.memory_space<vmem>>, vector<8x64xf32>,
    } else {
    }
    return
  }
  func.func @transform_0(%arg0: i32, %arg1: i32, %arg2: i32) -> (i32, i32) {
    %c0_i32 = arith.constant 0 : i32
    return %arg0, %arg2 : i32, i32
  }
  func.func @transform_1(%arg0: i32, %arg1: i32, %arg2: i32) -> (i32, i32) {
    %c0_i32 = arith.constant 0 : i32
    return %arg2, %arg1 : i32, i32
  }
  func.func @transform_2(%arg0: i32, %arg1: i32, %arg2: i32) -> (i32, i32) {
    %c0_i32 = arith.constant 0 : i32
    %c0_i32_0 = arith.constant 0 : i32
    return %c0_i32, %arg1 : i32, i32
  }
  func.func @transform_3(%arg0: i32, %arg1: i32, %arg2: i32) -> (i32, i32) {
    %c0_i32 = arith.constant 0 : i32
    return %arg0, %arg1 : i32, i32
  }
}

</mosaic_0001>

<bundles_post_ra>
// kernel: tpu_custom_call.1
= control target key start
LH: loop header
LB: loop body
LE: loop exit
PB: predicated region body
PF: predicated region fallthrough
CT: control target
= control target key end

     0   :  { %v256_v1 = vmov 0   ;;  %vm20_vm0 = vcmask 523264   ;;  %v257_v3 = vmov 0.0   ;;  %s337_s0 = inlined_call_operand.vmem [shape: bf16[8,192], index: 0, kind: input, shape index: {}]   ;;  %s338_s1 = inlined_call_operand.vmem [shape: bf16[192,64], index: 1, kind: input, shape index: {}]   ;;  %s339_s2 = inlined_call_operand.vmem [shape: f32[1,64], index: 2, kind: input, shape index: {}]   ;;  %s340_s3 = inlined_call_operand.hbm [shape: f32[8,64], index: 3, kind: output, shape index: {}]  }
   0x1   :  { %v218_v0 = vld [vmem:[%s338_s1] sm:$0xff]   ;;  %130 = vmatprep.subr.bf16.mxu0 %v256_v1  ;;  %v219_v2 = vld [vmem:[%s338_s1 + $0x8] sm:$0xff]   ;;  %21 = vst.msk [vmem:[#allocation2] sm:$0xff] %vm20_vm0, %v257_v3  ;;  %v220_v4 = vld [vmem:[%s338_s1 + $0x10] sm:$0xff]  }
   0x2   :  { %131 = vmatpush1.bf16.msra.mxu0 %v218_v0  ;;  %v221_v5 = vld [vmem:[%s338_s1 + $0x18] sm:$0xff]   ;;  %v23_v6 = vld [vmem:[%s337_s0] sm:$0xff] }
   0x3   :  { %132 = vmatprep.subr.bf16.mxu0 %v256_v1 }
   0x6   :  { %133 = vmatpush1.bf16.msra.mxu0 %v219_v2 }
   0x7   :  { %134 = vmatprep.subr.bf16.mxu0 %v256_v1 }
   0xa   :  { %135 = vmatpush1.bf16.msra.mxu0 %v220_v4 }
   0xb   :  { %136 = vmatprep.subr.bf16.mxu0 %v256_v1 }
   0xc   :  { %8 = vsyncpa [#allocation4], 0  ;;  %v200_v7 = vcombine.high %v23_v6, %v23_v6  ;;  %v222_v8 = vld [vmem:[%s338_s1 + $0x20] sm:$0xff]   ;;  %v223_v9 = vld [vmem:[%s338_s1 + $0x28] sm:$0xff]   ;;  %v199_v16 = vcombine.low %v23_v6, %v23_v6  ;;  %s258_s12 = smov [#allocation3]  }
   0xd   :  { %v224_v10 = vld [vmem:[%s338_s1 + $0x30] sm:$0xff]   ;;  %v225_v11 = vld [vmem:[%s338_s1 + $0x38] sm:$0xff]   ;;  %v226_v12 = vld [vmem:[%s338_s1 + $0x40] sm:$0xff]   ;;  %s191_s13 = sshll.u32 %s258_s12, 4  ;;  %s192_s13 = int_to_ptr.vmem [resolvable:$true] %s191_s13 }
   0xe   :  { %137 = vmatpush1.bf16.msra.mxu0 %v221_v5  ;;  %213 = vmatprep.mubr.msk.bf16.mxu0 %vm20_vm0, %v200_v7  ;;  %v227_v13 = vld [vmem:[%s338_s1 + $0x48] sm:$0xff]   ;;  %v228_v14 = vld [vmem:[%s338_s1 + $0x50] sm:$0xff]   ;;  %v229_v15 = vld [vmem:[%s338_s1 + $0x58] sm:$0xff]   ;;  %s232_s1 = scalar_lea.vmem %s192_s13, 128  ;;  %p237_p1 = scmp.lt.s32.totalorder %s192_s13, %s192_s13 }
   0xf   :  { %138 = vmatprep.subr.bf16.mxu0 %v256_v1  ;;  %v22_v17 = vld [vmem:[#allocation2] sm:$0xff]  ;;  %p233_p0 = scmp.ne.s32.totalorder %s192_s13, %s232_s1  ;;  %p238_p2 = scmp.lt.s32.totalorder %s232_s1, %s232_s1 }
  0x10   :  { %v214_v23 = vld [vmem:[%s339_s2] ss:$0 sm:$0xff] }
  0x11   :  { %p239_p3 = por %p238_p2, %p237_p1 }
  0x12   :  { %139 = vmatpush1.bf16.msra.mxu0 %v222_v8 }
  0x13   :  { %140 = vmatprep.subr.bf16.mxu0 %v256_v1  ;;  %p240_p4 = pnand %p239_p3, %p233_p0 }
  0x16   :  { %141 = vmatpush1.bf16.msra.mxu0 %v223_v9 }
  0x17   :  { %142 = vmatprep.subr.bf16.mxu0 %v256_v1 }
  0x1a   :  { %143 = vmatpush1.bf16.msra.mxu0 %v224_v10 }
  0x1b   :  { %144 = vmatprep.subr.bf16.mxu0 %v256_v1 }
  0x1e   :  { %145 = vmatpush1.bf16.msra.mxu0 %v225_v11 }
  0x1f   :  { %146 = vmatprep.subr.bf16.mxu0 %v256_v1 }
  0x22   :  { %147 = vmatpush1.bf16.msra.mxu0 %v226_v12 }
  0x23   :  { %148 = vmatprep.subr.bf16.mxu0 %v256_v1 }
  0x26   :  { %149 = vmatpush1.bf16.msra.mxu0 %v227_v13 }
  0x27   :  { %150 = vmatprep.subr.bf16.mxu0 %v256_v1 }
  0x2a   :  { %151 = vmatpush1.bf16.msra.mxu0 %v228_v14 }
  0x2b   :  { %152 = vmatprep.subr.bf16.mxu0 %v256_v1 }
  0x2e   :  { %153 = vmatpush1.bf16.msra.mxu0 %v229_v15 }
  0x31   :  { %163 = vmatmul.mubr.bf16.vlgmr.msra.gmra.mrb[0].mxu0 %v199_v16 }
 0x104   :  { %v164_v18 = vpop.f32.mrb[0].mxu0 }
 0x105   :  { %v170_v19 = vadd.f32 %v164_v18, %v22_v17  ;;  %v166_v20 = vpop.f32.mrb[1].mxu0 }
 0x106   :  { %v167_v21 = vpop.f32.mrb[2].mxu0 }
 0x107   :  { %171 = vst.msk [vmem:[#allocation2] sm:$0xff] %vm20_vm0, %v170_v19  ;;  %v168_v22 = vpop.f32.mrb[3].mxu0 }
 0x10e   :  { %v175_v24 = vld [vmem:[#allocation2] sm:$0xff] }
 0x10f   :  { %v183_v25 = vadd.f32 %v214_v23, %v175_v24 }
 0x111   :  { %184 = vst.msk [vmem:[#allocation3] sm:$0xff] %vm20_vm0, %v183_v25 }
 0x112   :  { %243 = shalt.err (!%p240_p4)
}
 0x113   :  { %s244_s16 = scalar_lea.hbm %s340_s3, 128 }
 0x114   :  { %p245_p5 = scmp.ne.s32.totalorder %s340_s3, %s244_s16  ;;  %p248_p6 = scmp.lt.u32.totalorder %s244_s16, %s340_s3 }
 0x116   :  { %p250_p7 = pnand %p248_p6, %p245_p5 }
 0x118   :  { %253 = shalt.err (!%p250_p7)
}
 0x119   :  { %194 = dma.vmem_to_hbm [thread:$0]  %s192_s13, 128, %s340_s3, [#allocation4]  }
 0x11a   :  { %254 = dma.done.wait [#allocation4], 128  }
 0x11b   :  { %255 = vsyncadd [#allocation4], 4294967168 }
 0x11c   :  { %198 = vsyncpa [#allocation4], 1 }

</bundles_post_ra>
